<compile_context>
chip_gen: v6e
topology: v6e:2x2x1
jax: 0.10.0
libtpu: 0.0.40
codegen_flags: <defaults>
</compile_context>

<pallas_src>
import math

import jax
import jax.numpy as jnp
from jax import lax
from jax.experimental import pallas as pl
from jax.experimental.pallas import tpu as pltpu

LOG2PI = math.log(2.0 * math.pi)
_LANES = 128


def _round_up(x: int, m: int) -> int:
    return ((x + m - 1) // m) * m


def _make_loss_kernel(sigma_lower_bound: float, block_rows: int, lanes: int,
                      rows_in_last_block: int):
    # Plain Python floats only -> lowered as literals, nothing is captured
    # as a traced constant (this was the previous compile failure).
    slb = float(sigma_lower_bound)
    log2pi = float(LOG2PI)
    needs_mask = rows_in_last_block != block_rows

    def loss_kernel(u_ref, v_ref, su_ref, tu_ref, tv_ref, out_ref):
        c = pl.program_id(0)   # TensorCore split ("parallel")
        i = pl.program_id(1)   # row-block sweep ("arbitrary", accumulating)

        @pl.when(i == 0)
        def _():
            out_ref[...] = jnp.zeros_like(out_ref)

        # Upcast in-kernel; HBM traffic stays in the native input dtype.
        u = u_ref[...].astype(jnp.float32)
        v = v_ref[...].astype(jnp.float32)
        su = su_ref[...].astype(jnp.float32)
        tu = tu_ref[...].astype(jnp.float32)
        tv = tv_ref[...].astype(jnp.float32)

        # softplus(x) = log(1 + exp(x)), numerically stable form.
        softplus = jnp.maximum(su, 0.0) + jnp.log1p(jnp.exp(-jnp.abs(su)))
        sigma2 = softplus + slb
        dtd = (u - tu) ** 2 + (v - tv) ** 2
        loss = 0.5 * (log2pi + 2.0 * jnp.log(sigma2)
                      + dtd * pl.reciprocal(sigma2, approx=False))

        def accumulate(x):
            # vreg-shaped accumulation into the resident output block: folding
            # over leading groups of 8 sublanes is pure VPU adds; the single
            # cross-lane reduce happens in the wrapper.
            out_ref[0] += x.reshape(block_rows // 8, 8, lanes).sum(axis=0)

        if needs_mask:
            # Only the globally-last block can contain out-of-range rows; keep
            # the iota/compare/select off the steady-state loop entirely.
            is_last = jnp.logical_and(c == pl.num_programs(0) - 1,
                                      i == pl.num_programs(1) - 1)

            @pl.when(jnp.logical_not(is_last))
            def _():
                accumulate(loss)

            @pl.when(is_last)
            def _():
                row_ids = lax.broadcasted_iota(
                    jnp.int32, (block_rows, lanes), 0)
                accumulate(jnp.where(row_ids < rows_in_last_block, loss, 0.0))
        else:
            accumulate(loss)

    return loss_kernel


def _tail_loss(u, v, su, tu, tv, slb):
    # Plain-XLA path for the (< 128 element) non-lane-aligned remainder;
    # avoids a full-array jnp.pad (extra HBM copy) in the wrapper.
    u, v, su, tu, tv = (t.astype(jnp.float32) for t in (u, v, su, tu, tv))
    sigma2 = jax.nn.softplus(su) + slb
    dtd = (u - tu) ** 2 + (v - tv) ** 2
    return jnp.sum(0.5 * (LOG2PI + 2.0 * jnp.log(sigma2) + dtd / sigma2))


def iid_isotropic_gaussian_uv_loss(u, v, sigma_u, target_u, target_v,
                                   sigma_lower_bound: float,
                                   block_rows: int = 4096):
    """Scalar f32 loss matching IIDIsotropicGaussianUVLoss.forward()."""
    lanes = _LANES
    inputs = (u, v, sigma_u, target_u, target_v)
    n = int(u.size)
    slb = float(sigma_lower_bound)

    # Sublane granule of the narrowest input dtype (f32 -> 8, bf16 -> 16,
    # int8/fp8 -> 32): keeps sub-32-bit inputs lowering-legal.
    granule = 8
    for t in inputs:
        itemsize = jnp.dtype(t.dtype).itemsize
        granule = max(granule, 8 * max(1, 4 // itemsize))

    rows = n // lanes                  # full lane-dense rows fed to the kernel
    n_main = rows * lanes
    flats = [jnp.ravel(t) for t in inputs]

    total = jnp.float32(0.0)
    if n_main != n:
        total = total + _tail_loss(*(f[n_main:] for f in flats), slb)

    if rows == 0:
        return total

    # Block rows: multiple of the sublane granule, never larger than needed.
    br = max(granule,
             min(_round_up(int(block_rows), granule),
                 _round_up(rows, granule)))
    num_blocks = pl.cdiv(rows, br)
    rows_in_last = rows - (num_blocks - 1) * br

    # Split the row-block sweep across the 2 TensorCores of a v7x megacore
    # when the block count divides evenly; on 1-TC chips (v5e/v6e) this is the
    # same serial loop, so it is harmless.
    num_cores = 2 if (num_blocks >= 2 and num_blocks % 2 == 0) else 1
    blocks_per_core = num_blocks // num_cores

    mains = [f[:n_main].reshape(rows, lanes) for f in flats]

    in_spec = pl.BlockSpec((br, lanes),
                           lambda c, i: (c * blocks_per_core + i, 0))
    # One lane-dense (8,128) partial-sum slab per core, resident across the
    # "arbitrary" axis (accumulator pattern); final reduce in the wrapper.
    out_spec = pl.BlockSpec((1, 8, lanes), lambda c, i: (c, 0, 0))

    partials = pl.pallas_call(
        _make_loss_kernel(slb, br, lanes, rows_in_last),
        out_shape=jax.ShapeDtypeStruct((num_cores, 8, lanes), jnp.float32),
        grid_spec=pltpu.PrefetchScalarGridSpec(
            num_scalar_prefetch=0,
            grid=(num_cores, blocks_per_core),
            in_specs=[in_spec] * 5,
            out_specs=out_spec,
        ),
        compiler_params=pltpu.CompilerParams(
            dimension_semantics=("parallel", "arbitrary"),
            # 5 inputs x 2 pipeline buffers x (4096*128*4B) = 20 MiB; leave
            # headroom while staying well under v7x's 64 MiB physical VMEM.
            vmem_limit_bytes=40 * 1024 * 1024),
    )(*mains)

    return total + jnp.sum(partials)


def reference_loss(u, v, sigma_u, target_u, target_v, sigma_lower_bound):
    sigma2 = jax.nn.softplus(sigma_u) + sigma_lower_bound
    dtd = (u - target_u) ** 2 + (v - target_v) ** 2
    loss = 0.5 * (LOG2PI + 2.0 * jnp.log(sigma2) + dtd / sigma2)
    return jnp.sum(loss)


if __name__ == "__main__":
    sigma_lower_bound = 2.0  # typical config value (UV_CONFIDENCE sigma bound)

    def check(shape, block_rows, case_key):
        ks = jax.random.split(case_key, 5)
        u, v, su, tu, tv = (jax.random.normal(k, shape, jnp.float32)
                            for k in ks)
        out = iid_isotropic_gaussian_uv_loss(
            u, v, su, tu, tv, sigma_lower_bound, block_rows=block_rows)
        out = jax.block_until_ready(out)
        ref = reference_loss(u, v, su, tu, tv, sigma_lower_bound)
        assert jnp.allclose(out, ref, rtol=1e-4, atol=1e-3), (shape, out, ref)

    root = jax.random.PRNGKey(0)
    k0, k1, k2 = jax.random.split(root, 3)

    # DensePose chart-predictor-like NCHW shape (lane-aligned, single block).
    check((2, 4, 16, 16), 4096, k0)
    # Unaligned total size: exercises masked last block + wrapper tail path.
    check((3, 5, 17, 19), 4096, k1)
    # Multi-block case: exercises the 2-way TensorCore split + masked block.
    check((1, 1, 40, 100), 8, k2)

    print("KERNEL_OK")
</pallas_src>

<mosaic_0001>
module attributes {stable_mosaic.version = 11 : i64} {
  func.func @loss_kernel(%arg0: i32, %arg1: i32, %arg2: memref<16x128xf32, #tpu.memory_space<vmem>>, %arg3: memref<16x128xf32, #tpu.memory_space<vmem>>, %arg4: memref<16x128xf32, #tpu.memory_space<vmem>>, %arg5: memref<16x128xf32, #tpu.memory_space<vmem>>, %arg6: memref<16x128xf32, #tpu.memory_space<vmem>>, %arg7: memref<1x8x128xf32, #tpu.memory_space<vmem>>) attributes {dimension_semantics = [#tpu.dimension_semantics<parallel>, #tpu.dimension_semantics<arbitrary>], iteration_bounds = array<i64: 1, 1>, scalar_prefetch = 0 : i64, scratch_operands = 0 : i64, tpu.core_type = #tpu.core_type<tc>, window_params = [{transform_indices = @transform_0, window_bounds = array<i64: 16, 128>}, {transform_indices = @transform_1, window_bounds = array<i64: 16, 128>}, {transform_indices = @transform_2, window_bounds = array<i64: 16, 128>}, {transform_indices = @transform_3, window_bounds = array<i64: 16, 128>}, {transform_indices = @transform_4, window_bounds = array<i64: 16, 128>}, {transform_indices = @transform_5, window_bounds = array<i64: 1, 8, 128>}]} {
    %c0_i32 = arith.constant 0 : i32
    %0 = arith.cmpi eq, %arg1, %c0_i32 : i32
    %1 = arith.extui %0 : i1 to i32
    %c0_i32_0 = arith.constant 0 : i32
    %2 = arith.cmpi ne, %1, %c0_i32_0 : i32
    scf.if %2 {
      %cst_22 = arith.constant 0.000000e+00 : f32
      %41 = vector.broadcast %cst_22 : f32 to vector<1x8x128xf32>
      %c0_23 = arith.constant 0 : index
      %c0_24 = arith.constant 0 : index
      %c0_25 = arith.constant 0 : index
      %42 = vector.load %arg7[%c0_23, %c0_24, %c0_25] : memref<1x8x128xf32, #tpu.memory_space<vmem>>, vector<1x8x128xf32>
      tpu.vector_store %arg7[%c0_23, %c0_24, %c0_25], %41 {strides = array<i32>} : memref<1x8x128xf32, #tpu.memory_space<vmem>>, vector<1x8x128xf32>,
    } else {
    }
    %c0 = arith.constant 0 : index
    %c0_1 = arith.constant 0 : index
    %3 = vector.load %arg2[%c0, %c0_1] : memref<16x128xf32, #tpu.memory_space<vmem>>, vector<16x128xf32>
    %c0_2 = arith.constant 0 : index
    %c0_3 = arith.constant 0 : index
    %4 = vector.load %arg3[%c0_2, %c0_3] : memref<16x128xf32, #tpu.memory_space<vmem>>, vector<16x128xf32>
    %c0_4 = arith.constant 0 : index
    %c0_5 = arith.constant 0 : index
    %5 = vector.load %arg4[%c0_4, %c0_5] : memref<16x128xf32, #tpu.memory_space<vmem>>, vector<16x128xf32>
    %c0_6 = arith.constant 0 : index
    %c0_7 = arith.constant 0 : index
    %6 = vector.load %arg5[%c0_6, %c0_7] : memref<16x128xf32, #tpu.memory_space<vmem>>, vector<16x128xf32>
    %c0_8 = arith.constant 0 : index
    %c0_9 = arith.constant 0 : index
    %7 = vector.load %arg6[%c0_8, %c0_9] : memref<16x128xf32, #tpu.memory_space<vmem>>, vector<16x128xf32>
    %cst = arith.constant 0.000000e+00 : f32
    %8 = vector.broadcast %cst : f32 to vector<16x128xf32>
    %9 = arith.maximumf %5, %8 : vector<16x128xf32>
    %10 = math.absf %5 : vector<16x128xf32>
    %cst_10 = arith.constant 0.000000e+00 : f32
    %11 = vector.broadcast %cst_10 : f32 to vector<16x128xf32>
    %12 = arith.subf %11, %10 : vector<16x128xf32>
    %13 = math.exp %12 : vector<16x128xf32>
    %14 = math.log1p %13 : vector<16x128xf32>
    %15 = arith.addf %9, %14 : vector<16x128xf32>
    %cst_11 = arith.constant 2.000000e+00 : f32
    %16 = vector.broadcast %cst_11 : f32 to vector<16x128xf32>
    %17 = arith.addf %15, %16 : vector<16x128xf32>
    %18 = arith.subf %3, %6 : vector<16x128xf32>
    %19 = arith.mulf %18, %18 : vector<16x128xf32>
    %20 = arith.subf %4, %7 : vector<16x128xf32>
    %21 = arith.mulf %20, %20 : vector<16x128xf32>
    %22 = arith.addf %19, %21 : vector<16x128xf32>
    %23 = math.log %17 : vector<16x128xf32>
    %cst_12 = arith.constant 2.000000e+00 : f32
    %24 = vector.broadcast %cst_12 : f32 to vector<16x128xf32>
    %25 = arith.mulf %24, %23 : vector<16x128xf32>
    %cst_13 = arith.constant 1.83787704 : f32
    %26 = vector.broadcast %cst_13 : f32 to vector<16x128xf32>
    %27 = arith.addf %26, %25 : vector<16x128xf32>
    %28 = tpu.reciprocal %17 : vector<16x128xf32> -> vector<16x128xf32>
    %29 = arith.mulf %22, %28 : vector<16x128xf32>
    %30 = arith.addf %27, %29 : vector<16x128xf32>
    %cst_14 = arith.constant 5.000000e-01 : f32
    %31 = vector.broadcast %cst_14 : f32 to vector<16x128xf32>
    %32 = arith.mulf %31, %30 : vector<16x128xf32>
    %c0_15 = arith.constant 0 : index
    %c0_16 = arith.constant 0 : index
    %c0_17 = arith.constant 0 : index
    %33 = vector.load %arg7[%c0_15, %c0_16, %c0_17] : memref<1x8x128xf32, #tpu.memory_space<vmem>>, vector<1x8x128xf32>
    %34 = vector.shape_cast %33 : vector<1x8x128xf32> to vector<8x128xf32>
    %35 = vector.shape_cast %32 : vector<16x128xf32> to vector<2x8x128xf32>
    %cst_18 = arith.constant dense<0.000000e+00> : vector<8x128xf32>
    %36 = vector.multi_reduction <add>, %35, %cst_18 [0] : vector<2x8x128xf32> to vector<8x128xf32>
    %37 = arith.addf %34, %36 : vector<8x128xf32>
    %c0_19 = arith.constant 0 : index
    %c0_20 = arith.constant 0 : index
    %c0_21 = arith.constant 0 : index
    %38 = vector.load %arg7[%c0_19, %c0_20, %c0_21] : memref<1x8x128xf32, #tpu.memory_space<vmem>>, vector<1x8x128xf32>
    %39 = vector.shape_cast %38 : vector<1x8x128xf32> to vector<8x128xf32>
    %40 = vector.shape_cast %37 : vector<8x128xf32> to vector<1x8x128xf32>
    tpu.vector_store %arg7[%c0_19, %c0_20, %c0_21], %40 {strides = array<i32>} : memref<1x8x128xf32, #tpu.memory_space<vmem>>, vector<1x8x128xf32>,
    return
  }
  func.func @transform_0(%arg0: i32, %arg1: i32) -> (i32, i32) {
    %c1_i32 = arith.constant 1 : i32
    %0 = arith.muli %arg0, %c1_i32 : i32
    %1 = arith.addi %0, %arg1 : i32
    %c0_i32 = arith.constant 0 : i32
    %c0_i32_0 = arith.constant 0 : i32
    return %1, %c0_i32 : i32, i32
  }
  func.func @transform_1(%arg0: i32, %arg1: i32) -> (i32, i32) {
    %c1_i32 = arith.constant 1 : i32
    %0 = arith.muli %arg0, %c1_i32 : i32
    %1 = arith.addi %0, %arg1 : i32
    %c0_i32 = arith.constant 0 : i32
    %c0_i32_0 = arith.constant 0 : i32
    return %1, %c0_i32 : i32, i32
  }
  func.func @transform_2(%arg0: i32, %arg1: i32) -> (i32, i32) {
    %c1_i32 = arith.constant 1 : i32
    %0 = arith.muli %arg0, %c1_i32 : i32
    %1 = arith.addi %0, %arg1 : i32
    %c0_i32 = arith.constant 0 : i32
    %c0_i32_0 = arith.constant 0 : i32
    return %1, %c0_i32 : i32, i32
  }
  func.func @transform_3(%arg0: i32, %arg1: i32) -> (i32, i32) {
    %c1_i32 = arith.constant 1 : i32
    %0 = arith.muli %arg0, %c1_i32 : i32
    %1 = arith.addi %0, %arg1 : i32
    %c0_i32 = arith.constant 0 : i32
    %c0_i32_0 = arith.constant 0 : i32
    return %1, %c0_i32 : i32, i32
  }
  func.func @transform_4(%arg0: i32, %arg1: i32) -> (i32, i32) {
    %c1_i32 = arith.constant 1 : i32
    %0 = arith.muli %arg0, %c1_i32 : i32
    %1 = arith.addi %0, %arg1 : i32
    %c0_i32 = arith.constant 0 : i32
    %c0_i32_0 = arith.constant 0 : i32
    return %1, %c0_i32 : i32, i32
  }
  func.func @transform_5(%arg0: i32, %arg1: i32) -> (i32, i32, i32) {
    %c0_i32 = arith.constant 0 : i32
    %c0_i32_0 = arith.constant 0 : i32
    %c0_i32_1 = arith.constant 0 : i32
    return %arg0, %c0_i32, %c0_i32_0 : i32, i32, i32
  }
}

</mosaic_0001>

<bundles_post_ra>
// kernel: tpu_custom_call.1
= control target key start
LH: loop header
LB: loop body
LE: loop exit
PB: predicated region body
PF: predicated region fallthrough
CT: control target
= control target key end

     0   :  { %10 = vsyncpa [#allocation3], 0  ;;  %s437_s0 = inlined_call_operand.hbm [shape: f32[16,128], index: 0, kind: input, shape index: {}]   ;;  %s438_s1 = inlined_call_operand.hbm [shape: f32[16,128], index: 1, kind: input, shape index: {}]   ;;  %s439_s2 = inlined_call_operand.hbm [shape: f32[16,128], index: 2, kind: input, shape index: {}]   ;;  %s440_s3 = inlined_call_operand.hbm [shape: f32[16,128], index: 3, kind: input, shape index: {}]   ;;  %s441_s4 = inlined_call_operand.hbm [shape: f32[16,128], index: 4, kind: input, shape index: {}]   ;;  %s442_s5 = inlined_call_operand.hbm [shape: f32[1,8,128], index: 5, kind: output, shape index: {}]  }
   0x1   :  { %11 = vsyncpa [#allocation6], 0 }
   0x2   :  { %12 = vsyncpa [#allocation9], 0 }
   0x3   :  { %13 = vsyncpa [#allocation4], 0  ;;  %s366_s18 = smov [#allocation5]   ;;  %s367_s20 = smov [#allocation8]  }
   0x4   :  { %s39_s19 = sshll.u32 %s366_s18, 4  ;;  %s71_s21 = sshll.u32 %s367_s20, 4  ;;  %s40_s19 = int_to_ptr.vmem [resolvable:$true] %s39_s19  ;;  %s72_s21 = int_to_ptr.vmem [resolvable:$true] %s71_s21 }
   0x5   :  { %s246_s22 = scalar_lea.vmem %s40_s19, 256  ;;  %p251_p1 = scmp.lt.s32.totalorder %s40_s19, %s40_s19 }
   0x6   :  { %p247_p0 = scmp.ne.s32.totalorder %s40_s19, %s246_s22  ;;  %p252_p2 = scmp.lt.s32.totalorder %s246_s22, %s246_s22 }
   0x8   :  { %p253_p3 = por %p252_p2, %p251_p1 }
   0xa   :  { %p254_p4 = pnand %p253_p3, %p247_p0 }
   0xc   :  { %257 = shalt.err (!%p254_p4)
}
   0xd   :  { %s368_s23 = smov 128   ;;  %s369_s24 = smov 8  }
   0xe   :  { %45 = dma.hbm_to_vmem [thread:$0]  %s438_s1, 256, %s40_s19, [#allocation6], %s368_s23, %s368_s23, %s369_s24  }
   0xf   :  { %s266_s27 = scalar_lea.vmem %s72_s21, 256  ;;  %p271_p6 = scmp.lt.s32.totalorder %s72_s21, %s72_s21 }
  0x10   :  { %p267_p5 = scmp.ne.s32.totalorder %s72_s21, %s266_s27  ;;  %p272_p7 = scmp.lt.s32.totalorder %s266_s27, %s266_s27 }
  0x12   :  { %p273_p8 = por %p272_p7, %p271_p6 }
  0x14   :  { %p274_p9 = pnand %p273_p8, %p267_p5 }
  0x16   :  { %277 = shalt.err (!%p274_p9)
}
  0x17   :  { %77 = dma.hbm_to_vmem [thread:$0]  %s440_s3, 256, %s72_s21, [#allocation9], %s368_s23, %s368_s23, %s369_s24  }
  0x18   :  { %s370_s30 = smov [#allocation2]   ;;  %s371_s7 = smov [#allocation7]  }
  0x19   :  { %s23_s6 = sshll.u32 %s370_s30, 4  ;;  %s55_s8 = sshll.u32 %s371_s7, 4  ;;  %s24_s6 = int_to_ptr.vmem [resolvable:$true] %s23_s6  ;;  %s56_s8 = int_to_ptr.vmem [resolvable:$true] %s55_s8 }
  0x1a   :  { %s286_s1 = scalar_lea.vmem %s24_s6, 256  ;;  %p291_p11 = scmp.lt.s32.totalorder %s24_s6, %s24_s6 }
  0x1b   :  { %p287_p10 = scmp.ne.s32.totalorder %s24_s6, %s286_s1  ;;  %p292_p12 = scmp.lt.s32.totalorder %s286_s1, %s286_s1 }
  0x1d   :  { %p293_p13 = por %p292_p12, %p291_p11 }
  0x1f   :  { %p294_p0 = pnand %p293_p13, %p287_p10 }
  0x21   :  { %297 = shalt.err (!%p294_p0)
}
  0x22   :  { %29 = dma.hbm_to_vmem [thread:$0]  %s437_s0, 256, %s24_s6, [#allocation3], %s368_s23, %s368_s23, %s369_s24  }
  0x23   :  { %s306_s3 = scalar_lea.vmem %s56_s8, 256  ;;  %p311_p2 = scmp.lt.s32.totalorder %s56_s8, %s56_s8 }
  0x24   :  { %p307_p1 = scmp.ne.s32.totalorder %s56_s8, %s306_s3  ;;  %p312_p3 = scmp.lt.s32.totalorder %s306_s3, %s306_s3 }
  0x26   :  { %p313_p4 = por %p312_p3, %p311_p2 }
  0x28   :  { %p314_p5 = pnand %p313_p4, %p307_p1 }
  0x2a   :  { %317 = shalt.err (!%p314_p5)
}
  0x2b   :  { %61 = dma.hbm_to_vmem [thread:$0]  %s439_s2, 256, %s56_s8, [#allocation6], %s368_s23, %s368_s23, %s369_s24  }
  0x2c   :  { %s372_s13 = smov [#allocation10]  }
  0x2d   :  { %s87_s14 = sshll.u32 %s372_s13, 4  ;;  %s88_s14 = int_to_ptr.vmem [resolvable:$true] %s87_s14 }
  0x2e   :  { %s326_s15 = scalar_lea.vmem %s88_s14, 256  ;;  %p331_p7 = scmp.lt.s32.totalorder %s88_s14, %s88_s14 }
  0x2f   :  { %p327_p6 = scmp.ne.s32.totalorder %s88_s14, %s326_s15  ;;  %p332_p8 = scmp.lt.s32.totalorder %s326_s15, %s326_s15 }
  0x31   :  { %p333_p9 = por %p332_p8, %p331_p7 }
  0x33   :  { %p334_p10 = pnand %p333_p9, %p327_p6 }
  0x35   :  { %337 = shalt.err (!%p334_p10)
}
  0x36   :  { %93 = dma.hbm_to_vmem [thread:$0]  %s441_s4, 256, %s88_s14, [#allocation9], %s368_s23, %s368_s23, %s369_s24  }
  0x37   :  { %358 = dma.done.wait [#allocation3], 256  }
  0x38   :  { %359 = vsyncadd [#allocation3], 4294967040 }
  0x39   :  { %360 = dma.done.wait [#allocation6], 512  }
  0x3a   :  { %361 = vsyncadd [#allocation6], 4294966784 }
  0x3b   :  { %362 = dma.done.wait [#allocation9], 512  }
  0x3c   :  { %363 = vsyncadd [#allocation9], 4294966784  ;;  %v128_v0 = vld [vmem:[#allocation7] sm:$0xff]  ;;  %v129_v1 = vld [vmem:[#allocation7 + $0x8] sm:$0xff]  ;;  %s373_s2 = smov [#allocation11]  }
  0x3d   :  { %v136_v2 = vand.u32 2147483647, %v128_v0  ;;  %v137_v3 = vand.u32 2147483647, %v129_v1  ;;  %v134_v20 = vmax.f32 %v128_v0, 0.0  ;;  %v135_v23 = vmax.f32 %v129_v1, 0.0 }
  0x3e   :  { %v124_v32 = vld [vmem:[#allocation2] sm:$0xff]  ;;  %v125_v33 = vld [vmem:[#allocation2 + $0x8] sm:$0xff]  ;;  %v126_v34 = vld [vmem:[#allocation5] sm:$0xff]  ;;  %s202_s4 = sshll.u32 %s373_s2, 4  ;;  %s203_s4 = int_to_ptr.vmem [resolvable:$true] %s202_s4 }
  0x3f   :  { %v138_v4 = vsub.f32 0.0, %v136_v2  ;;  %v139_v5 = vsub.f32 0.0, %v137_v3  ;;  %v130_v35 = vld [vmem:[#allocation8] sm:$0xff]  ;;  %v132_v36 = vld [vmem:[#allocation10] sm:$0xff]  ;;  %v127_v37 = vld [vmem:[#allocation5 + $0x8] sm:$0xff]  ;;  %s338_s17 = scalar_lea.vmem %s203_s4, 128  ;;  %p343_p12 = scmp.lt.s32.totalorder %s203_s4, %s203_s4 }
  0x40   :  { %v131_v38 = vld [vmem:[#allocation8 + $0x8] sm:$0xff]  ;;  %v133_v39 = vld [vmem:[#allocation10 + $0x8] sm:$0xff]  ;;  %v166_v40 = vsub.f32 %v124_v32, %v130_v35  ;;  %v170_v41 = vsub.f32 %v126_v34, %v132_v36  ;;  %p339_p11 = scmp.ne.s32.totalorder %s203_s4, %s338_s17  ;;  %p344_p13 = scmp.lt.s32.totalorder %s338_s17, %s338_s17 }
  0x41   :  { %v140_v6 = vmul.f32 1.442695, %v138_v4  ;;  %v142_v7 = vmul.f32 1.442695, %v139_v5  ;;  %v167_v42 = vsub.f32 %v125_v33, %v131_v38  ;;  %v171_v43 = vsub.f32 %v127_v37, %v133_v39 }
  0x42   :  { %v168_v44 = vmul.f32 %v166_v40, %v166_v40  ;;  %v172_v45 = vmul.f32 %v170_v41, %v170_v41  ;;  %p345_p0 = por %p344_p13, %p343_p12 }
  0x43   :  { %222 = vpow2.f32 %v140_v6  ;;  %v169_v46 = vmul.f32 %v167_v42, %v167_v42  ;;  %v173_v47 = vmul.f32 %v171_v43, %v171_v43 }
  0x44   :  { %224 = vpow2.f32 %v142_v7  ;;  %v174_v48 = vadd.f32 %v172_v45, %v168_v44  ;;  %p346_p1 = pnand %p345_p0, %p339_p11 }
  0x45   :  { %v175_v50 = vadd.f32 %v173_v47, %v169_v46 }
  0x50   :  { %v223_v8 = vpop.eup %222 }
  0x51   :  { %v225_v9 = vpop.eup %224  ;;  %v144_v10 = vadd.f32 1.0, %v223_v8  ;;  %v147_v12 = vmul.f32 -0.5, %v223_v8  ;;  %v150_v15 = vand.u32 2147483647, %v223_v8 }
  0x52   :  { %v153_v11 = vadd.f32 1.0, %v225_v9  ;;  %v156_v13 = vmul.f32 -0.5, %v225_v9  ;;  %v159_v17 = vand.u32 2147483647, %v225_v9 }
  0x53   :  { %226 = vlog2.f32 %v144_v10  ;;  %v148_v14 = vadd.f32 1.0, %v147_v12  ;;  %vm151_vm0 = vcmp.lt.f32.partialorder %v150_v15, 0.0004427343 }
  0x54   :  { %228 = vlog2.f32 %v153_v11  ;;  %v157_v16 = vadd.f32 1.0, %v156_v13  ;;  %vm160_vm1 = vcmp.lt.f32.partialorder %v159_v17, 0.0004427343 }
  0x55   :  { %v149_v18 = vmul.f32 %v223_v8, %v148_v14 }
  0x56   :  { %v158_v21 = vmul.f32 %v225_v9, %v157_v16 }
  0x60   :  { %v227_v19 = vpop.eup %226 }
  0x61   :  { %v229_v22 = vpop.eup %228  ;;  %v146_v24 = vmul.f32 0.6931472, %v227_v19 }
  0x62   :  { %v155_v25 = vmul.f32 0.6931472, %v229_v22 }
  0x63   :  { %v152_v26 = vsel %vm151_vm0, %v149_v18, %v146_v24 }
  0x64   :  { %v161_v27 = vsel %vm160_vm1, %v158_v21, %v155_v25  ;;  %v162_v28 = vadd.f32 %v152_v26, %v134_v20 }
  0x65   :  { %v163_v29 = vadd.f32 %v161_v27, %v135_v23 }
  0x66   :  { %v164_v30 = vadd.f32 2.0, %v162_v28 }
  0x67   :  { %v165_v31 = vadd.f32 2.0, %v163_v29 }
  0x68   :  { %230 = vlog2.f32 %v164_v30 }
  0x69   :  { %232 = vlog2.f32 %v165_v31 }
  0x6a   :  { %234 = vrcp.f32 %v164_v30 }
  0x6b   :  { %236 = vrcp.f32 %v165_v31 }
  0x75   :  { %v231_v49 = vpop.eup %230 }
  0x76   :  { %v233_v51 = vpop.eup %232  ;;  %v177_v52 = vmul.f32 0.6931472, %v231_v49 }
  0x77   :  { %v235_v53 = vpop.eup %234  ;;  %v179_v54 = vmul.f32 0.6931472, %v233_v51 }
  0x78   :  { %v237_v55 = vpop.eup %236  ;;  %v180_v56 = vmul.f32 2.0, %v177_v52  ;;  %v186_v57 = vmul.f32 %v235_v53, %v174_v48 }
  0x79   :  { %v181_v58 = vmul.f32 2.0, %v179_v54  ;;  %v187_v59 = vmul.f32 %v237_v55, %v175_v50 }
  0x7a   :  { %v182_v60 = vadd.f32 1.837877, %v180_v56 }
  0x7b   :  { %v183_v61 = vadd.f32 1.837877, %v181_v58 }
  0x7c   :  { %v188_v62 = vadd.f32 %v186_v57, %v182_v60 }
  0x7d   :  { %v189_v63 = vadd.f32 %v187_v59, %v183_v61 }
  0x7e   :  { %v190_v0 = vmul.f32 0.5, %v188_v62 }
  0x7f   :  { %v191_v1 = vmul.f32 0.5, %v189_v63 }
  0x81   :  { %v193_v2 = vadd.f32 %v191_v1, %v190_v0 }
  0x83   :  { %195 = vst [vmem:[#allocation11] sm:$0xff] %v193_v2 }
  0x84   :  { %349 = shalt.err (!%p346_p1)
}
  0x85   :  { %205 = dma.vmem_to_hbm [thread:$0]  %s203_s4, 128, %s442_s5, [#allocation4]  }
  0x86   :  { %364 = dma.done.wait [#allocation4], 128  }
  0x87   :  { %365 = vsyncadd [#allocation4], 4294967168 }
  0x88   :  { %209 = vsyncpa [#allocation3], 1 }
  0x89   :  { %210 = vsyncpa [#allocation6], 1 }
  0x8a   :  { %211 = vsyncpa [#allocation9], 1 }
  0x8b   :  { %212 = vsyncpa [#allocation4], 1 }

</bundles_post_ra>
